<compile_context>
chip_gen: v7x
topology: tpu7x:2x2x1
jax: 0.10.0
libtpu: 0.0.40
codegen_flags: <defaults>
</compile_context>

<pallas_src>
import functools
import math

import jax
import jax.numpy as jnp
from jax.experimental import pallas as pl
from jax.experimental.pallas import tpu as pltpu


# ----------------------------------------------------------------------------
# Pallas kernels
# ----------------------------------------------------------------------------
def _conv_fold_kernel(x_ref, w_ref, b_ref, o_ref, *, taps, tsp, tiled):
    """Small-cin path: all KH*KW taps folded into one MXU contraction."""
    base = 0
    if tiled:
        base = pl.multiple_of(pl.program_id(3) * tsp, 128)
    if len(taps) == 1:
        xs = x_ref[:, pl.ds(base + taps[0], tsp)]
    else:
        xs = jnp.concatenate(
            [x_ref[:, pl.ds(base + off, tsp)] for off in taps], axis=0)
    acc = jnp.dot(w_ref[...], xs, preferred_element_type=jnp.float32)
    o_ref[...] = (acc + b_ref[...]).astype(o_ref.dtype)


def _conv_tap_kernel(x_ref, w_ref, b_ref, o_ref, *, taps, tsp, tiled):
    """Large-cin path: one shifted matmul per tap, accumulated in a local value."""
    base = 0
    if tiled:
        base = pl.multiple_of(pl.program_id(3) * tsp, 128)
    acc = None
    for t, off in enumerate(taps):
        xs = x_ref[:, pl.ds(base + off, tsp)]
        part = jnp.dot(w_ref[t], xs, preferred_element_type=jnp.float32)
        acc = part if acc is None else acc + part
    o_ref[...] = (acc + b_ref[...]).astype(o_ref.dtype)


# ----------------------------------------------------------------------------
# Host-side helpers
# ----------------------------------------------------------------------------
def _round_up(v, m):
    return ((v + m - 1) // m) * m


def _vmem_budget():
    """Per-generation VMEM budget (v7x has 64 MiB, v5e/v6e have 128 MiB)."""
    cap = None
    try:
        info = pltpu.get_tpu_info()
        cap = getattr(info, "vmem_capacity_bytes", None)
    except Exception:
        cap = None
    if not cap:
        cap = 64 * 1024 * 1024               # conservative (v7x-sized) fallback
    if cap <= 64 * 1024 * 1024:
        return int(0.6 * cap)                # ~38 MiB on v7x
    return min(int(0.75 * cap), 96 * 1024 * 1024)   # ~96 MiB on v5e/v6e


# ----------------------------------------------------------------------------
# Main wrapper
# ----------------------------------------------------------------------------
@functools.partial(
    jax.jit,
    static_argnames=("kernel_size", "stride", "padding", "dilation", "groups",
                     "scale", "compute_dtype"))
def lora_conv2d(x, weight, bias, lora_A, lora_B, *, kernel_size, stride,
                padding, dilation, groups, scale, compute_dtype):
    # TODO(synk): only integer (square) stride / padding / dilation supported.
    N, Cin, H, W = x.shape
    KH, KW = kernel_size
    Cout = weight.shape[0]
    G = groups
    cin_g = Cin // G
    cout_g = Cout // G
    s, d, p = stride, dilation, padding
    T = KH * KW

    # ---- merge LoRA into the weight in f32 (matches the torch module) ------
    if lora_A is not None:
        delta = jnp.matmul(lora_B.astype(jnp.float32), lora_A.astype(jnp.float32))
        weight = weight + delta.reshape(Cout, cin_g, KH, KW) * scale

    Hp, Wp = H + 2 * p, W + 2 * p
    OH = (Hp - d * (KH - 1) - 1) // s + 1
    OW = (Wp - d * (KW - 1) - 1) // s + 1
    PH = -(-Hp // s)                      # rows stored per stride-phase
    PW = -(-Wp // s)                      # cols stored per stride-phase
    LOUT = OH * PW                        # gapped output row length (lanes)
    max_row = (d * (KH - 1)) // s         # max per-tap row shift (phase rows)

    # ---- tile sizes ---------------------------------------------------------
    cin_gp = _round_up(cin_g, 8)
    fold = cin_gp <= 128                  # fold taps into K when channels small
    cout_gp = _round_up(cout_g, 8)
    if cout_gp <= 256:
        TCO = cout_gp
    else:
        TCO = 256
        cout_gp = _round_up(cout_gp, TCO)
    n_co = cout_gp // TCO

    vmem_budget = _vmem_budget()
    target_lanes = 2048 if vmem_budget <= 48 * 2**20 else 4096
    m_align = 128 // math.gcd(PW, 128)    # min out-row tile with 128-lane blocks

    def plan(toh_req):
        if toh_req >= OH:
            toh, n_sp, tsp, tiled = OH, 1, LOUT, False
        else:
            toh = toh_req
            n_sp = -(-OH // toh)
            tsp, tiled = toh * PW, True
        rows_t = max(PH + 1, max_row + n_sp * toh + 1)   # keeps tap reads in-range
        blk_len = rows_t * PW
        LX = s * s * blk_len
        x_b = cin_gp * LX * 2
        w_b = TCO * T * cin_gp * 2
        o_b = TCO * tsp * x.dtype.itemsize
        tmp_b = (T * cin_gp * tsp * 2) if fold else (cin_gp * tsp * 2)
        acc_b = TCO * tsp * 4
        est = 2 * (x_b + w_b + o_b) + tmp_b + acc_b + (2 << 20)
        return toh, n_sp, tsp, tiled, rows_t, blk_len, LX, est

    toh_req = max(m_align, (max(1, target_lanes // PW) // m_align) * m_align)
    toh, n_sp, tsp, tiled, rows_t, blk_len, LX, est = plan(toh_req)
    while est > vmem_budget and toh_req > m_align:
        toh_req = max(m_align, (toh_req // 2 // m_align) * m_align)
        toh, n_sp, tsp, tiled, rows_t, blk_len, LX, est = plan(toh_req)
    # TODO(synk): if the x block alone busts VMEM (huge cin_g * spatial) add a
    # cin reduction grid axis; not needed for realistic conv shapes.

    # ---- input: pad once, split into stride phases, flatten spatial --------
    xp = jnp.pad(x, ((0, 0), (0, 0), (p, p), (p, p)))
    phases = []
    for ph in range(s):
        for pw in range(s):
            blk = xp[:, :, ph::s, pw::s]
            blk = jnp.pad(blk, ((0, 0), (0, 0),
                                (0, rows_t - blk.shape[2]),
                                (0, PW - blk.shape[3])))
            phases.append(blk.reshape(N, Cin, blk_len))
    x_flat = phases[0] if s == 1 else jnp.concatenate(phases, axis=2)
    x_k = x_flat.reshape(N, G, cin_g, LX)
    if cin_gp != cin_g:
        x_k = jnp.pad(x_k, ((0, 0), (0, 0), (0, cin_gp - cin_g), (0, 0)))
    x_k = x_k.astype(compute_dtype)
    # TODO(synk): consider CompilerParams(allow_input_fusion=...) to fuse the
    # pad/cast pass into the pallas_call input DMA.

    # ---- weights / bias ------------------------------------------------------
    w = weight.reshape(G, cout_g, cin_g, KH, KW)
    w = jnp.pad(w, ((0, 0), (0, cout_gp - cout_g), (0, cin_gp - cin_g),
                    (0, 0), (0, 0)))
    if fold:
        # K layout = (tap-major, channel-minor): (G, Cout, KH, KW, Cin) flatten
        w_k = (w.transpose(0, 1, 3, 4, 2)
               .reshape(G, cout_gp, T * cin_gp).astype(compute_dtype))
    else:
        w_k = (w.transpose(0, 3, 4, 1, 2)
               .reshape(G, T, cout_gp, cin_gp).astype(compute_dtype))

    b_full = (jnp.zeros((Cout,), jnp.float32) if bias is None
              else bias.astype(jnp.float32))
    b_k = b_full.reshape(G, cout_g)
    if cout_gp != cout_g:
        b_k = jnp.pad(b_k, ((0, 0), (0, cout_gp - cout_g)))
    b_k = b_k[:, :, None]                                   # (G, cout_gp, 1)

    # ---- static tap offsets into the flattened spatial axis -----------------
    taps = []
    for i in range(KH):
        for j in range(KW):
            row, ph = divmod(i * d, s)
            col, pw = divmod(j * d, s)
            taps.append((ph * s + pw) * blk_len + row * PW + col)
    taps = tuple(taps)

    # ---- grid order: keep the bigger operand resident -----------------------
    w_blk_bytes = TCO * T * cin_gp * 2
    x_blk_bytes = cin_gp * LX * 2
    wA = 1 if n_co == 1 else N * n_co       # weight fetches, batch-outer order
    xA = N
    wB = n_co                               # weight fetches, cout-outer order
    xB = n_co * N if N > 1 else 1
    batch_outer = (wA * w_blk_bytes + xA * x_blk_bytes
                   <= wB * w_blk_bytes + xB * x_blk_bytes)

    if batch_outer:
        grid = (G, N, n_co, n_sp)
        xm = lambda g, n, co, sp: (n, g, 0, 0)
        wmf = lambda g, n, co, sp: (g, co, 0)
        wmt = lambda g, n, co, sp: (g, 0, co, 0)
        bm = lambda g, n, co, sp: (g, co, 0)
        om = lambda g, n, co, sp: (n, g, co, sp)
    else:
        grid = (G, n_co, N, n_sp)
        xm = lambda g, co, n, sp: (n, g, 0, 0)
        wmf = lambda g, co, n, sp: (g, co, 0)
        wmt = lambda g, co, n, sp: (g, 0, co, 0)
        bm = lambda g, co, n, sp: (g, co, 0)
        om = lambda g, co, n, sp: (n, g, co, sp)

    x_spec = pl.BlockSpec((None, None, cin_gp, LX), xm)
    b_spec = pl.BlockSpec((None, TCO, 1), bm)
    o_spec = pl.BlockSpec((None, None, TCO, tsp), om)
    if fold:
        w_spec = pl.BlockSpec((None, TCO, T * cin_gp), wmf)
        kernel = functools.partial(_conv_fold_kernel, taps=taps, tsp=tsp,
                                   tiled=tiled)
    else:
        w_spec = pl.BlockSpec((None, T, TCO, cin_gp), wmt)
        kernel = functools.partial(_conv_tap_kernel, taps=taps, tsp=tsp,
                                   tiled=tiled)

    out = pl.pallas_call(
        kernel,
        out_shape=jax.ShapeDtypeStruct((N, G, cout_gp, n_sp * tsp), x.dtype),
        grid_spec=pltpu.PrefetchScalarGridSpec(
            num_scalar_prefetch=0,
            grid=grid,
            in_specs=[x_spec, w_spec, b_spec],
            out_specs=o_spec),
        compiler_params=pltpu.CompilerParams(
            dimension_semantics=("parallel", "parallel", "parallel", "parallel"),
            vmem_limit_bytes=int(vmem_budget)),
    )(x_k, w_k, b_k)

    # Compact gapped rows (., PW) -> (OH, OW), drop Cout padding, NCHW output.
    out = out.reshape(N, G, cout_gp, n_sp * toh, PW)[:, :, :cout_g, :OH, :OW]
    return out.reshape(N, Cout, OH, OW)


# ----------------------------------------------------------------------------
# Module wrapper
# ----------------------------------------------------------------------------
class LoraConv2d:
    """JAX/Pallas port of marveltoolbox.lora.nn.Conv2d (forward pass only)."""

    def __init__(self, in_channels, out_channels, kernel_size, stride=1,
                 padding=0, dilation=1, groups=1, bias=True, key=None,
                 compute_dtype=jnp.bfloat16):
        assert in_channels % groups == 0 and out_channels % groups == 0
        self.in_channels = in_channels
        self.out_channels = out_channels
        self.kernel_size = ((kernel_size, kernel_size)
                            if isinstance(kernel_size, int)
                            else tuple(kernel_size))
        self.stride = int(stride)
        self.padding = int(padding)
        self.dilation = int(dilation)
        self.groups = groups
        self.compute_dtype = compute_dtype
        kh, kw = self.kernel_size

        k0, k1 = jax.random.split(key)
        fan_in = (in_channels // groups) * kh * kw
        # kaiming_uniform_(a=sqrt(5)) -> U(-b, b) with b = sqrt(6 / (6 * fan_in))
        bound_w = math.sqrt(6.0 / (6.0 * fan_in))
        self.weight = jax.random.uniform(
            k0, (out_channels, in_channels // groups, kh, kw),
            minval=-bound_w, maxval=bound_w, dtype=jnp.float32)
        if bias:
            bound_b = 1.0 / math.sqrt(fan_in)
            self.bias = jax.random.uniform(
                k1, (out_channels,), minval=-bound_b, maxval=bound_b,
                dtype=jnp.float32)
        else:
            self.bias = None

        self.enable_lora = False
        self.lora_A = None
        self.lora_B = None
        self.scale = 0.0

    def set_lora_configs(self, rank, alpha, key):
        kh, kw = self.kernel_size
        K = (self.in_channels // self.groups) * kh * kw
        self.rank = rank
        self.scale = alpha / rank
        kA, kB = jax.random.split(key)
        self.lora_A = jax.random.normal(kA, (rank, K), dtype=jnp.float32)
        # The torch module zero-inits lora_B; use small non-zero values so the
        # LoRA path is numerically non-trivial in the demo.
        self.lora_B = 0.01 * jax.random.normal(kB, (self.out_channels, rank),
                                               dtype=jnp.float32)
        self.enable_lora = True

    def __call__(self, x):
        use_lora = self.enable_lora
        return lora_conv2d(
            x, self.weight, self.bias,
            self.lora_A if use_lora else None,
            self.lora_B if use_lora else None,
            kernel_size=self.kernel_size, stride=self.stride,
            padding=self.padding, dilation=self.dilation, groups=self.groups,
            scale=float(self.scale) if use_lora else 0.0,
            compute_dtype=self.compute_dtype)


# ----------------------------------------------------------------------------
# Reference (module semantics at the same bf16-in / f32-accumulate precision)
# ----------------------------------------------------------------------------
def _reference(x, weight, bias, lora_A, lora_B, scale, stride, padding,
               dilation, groups, compute_dtype):
    w = weight
    if lora_A is not None:
        Cout, cin_g, KH, KW = weight.shape
        w = w + (lora_B @ lora_A).reshape(Cout, cin_g, KH, KW) * scale
    out = jax.lax.conv_general_dilated(
        x.astype(compute_dtype), w.astype(compute_dtype),
        window_strides=(stride, stride),
        padding=[(padding, padding), (padding, padding)],
        rhs_dilation=(dilation, dilation),
        feature_group_count=groups,
        dimension_numbers=("NCHW", "OIHW", "NCHW"),
        preferred_element_type=jnp.float32)
    if bias is not None:
        out = out + bias[None, :, None, None]
    return out.astype(x.dtype)


# ----------------------------------------------------------------------------
if __name__ == "__main__":
    key = jax.random.PRNGKey(0)
    kx1, kp1, kl1, kx2, kp2, kx3, kp3 = jax.random.split(key, 7)

    # --- test 1: 3x3, stride 1, pad 1, LoRA enabled --------------------------
    N, Cin, H, W, Cout, ksz = 2, 4, 16, 16, 8, 3
    x1 = jax.random.normal(kx1, (N, Cin, H, W), dtype=jnp.float32)
    conv1 = LoraConv2d(Cin, Cout, ksz, stride=1, padding=1, key=kp1)
    conv1.set_lora_configs(rank=4, alpha=8, key=kl1)
    out1 = jax.block_until_ready(conv1(x1))
    ref1 = _reference(x1, conv1.weight, conv1.bias, conv1.lora_A, conv1.lora_B,
                      conv1.scale, 1, 1, 1, 1, jnp.bfloat16)
    assert out1.shape == ref1.shape == (N, Cout, H, W), (out1.shape, ref1.shape)
    assert jnp.allclose(out1, ref1, atol=5e-2, rtol=5e-2), float(
        jnp.max(jnp.abs(out1 - ref1)))

    # --- test 2: stride 2, grouped, no LoRA ----------------------------------
    x2 = jax.random.normal(kx2, (2, 4, 16, 16), dtype=jnp.float32)
    conv2 = LoraConv2d(4, 8, 3, stride=2, padding=1, groups=2, key=kp2)
    out2 = jax.block_until_ready(conv2(x2))
    ref2 = _reference(x2, conv2.weight, conv2.bias, None, None, 0.0,
                      2, 1, 1, 2, jnp.bfloat16)
    assert out2.shape == ref2.shape == (2, 8, 8, 8), (out2.shape, ref2.shape)
    assert jnp.allclose(out2, ref2, atol=2e-2, rtol=2e-2), float(
        jnp.max(jnp.abs(out2 - ref2)))

    # --- test 3: dilation 2, no bias -----------------------------------------
    x3 = jax.random.normal(kx3, (2, 4, 16, 16), dtype=jnp.float32)
    conv3 = LoraConv2d(4, 8, 3, stride=1, padding=2, dilation=2, bias=False,
                       key=kp3)
    out3 = jax.block_until_ready(conv3(x3))
    ref3 = _reference(x3, conv3.weight, None, None, None, 0.0,
                      1, 2, 2, 1, jnp.bfloat16)
    assert out3.shape == ref3.shape == (2, 8, 16, 16), (out3.shape, ref3.shape)
    assert jnp.allclose(out3, ref3, atol=2e-2, rtol=2e-2), float(
        jnp.max(jnp.abs(out3 - ref3)))

    print("KERNEL_OK")
</pallas_src>

<mosaic_0001>
module attributes {stable_mosaic.version = 11 : i64} {
  func.func @_conv_fold_kernel(%arg0: i32, %arg1: i32, %arg2: i32, %arg3: i32, %arg4: memref<1x1x8x342xbf16, #tpu.memory_space<vmem>>, %arg5: memref<1x8x72xbf16, #tpu.memory_space<vmem>>, %arg6: memref<1x8x1xf32, #tpu.memory_space<vmem>>, %arg7: memref<1x1x8x288xf32, #tpu.memory_space<vmem>>) attributes {dimension_semantics = [#tpu.dimension_semantics<parallel>, #tpu.dimension_semantics<parallel>, #tpu.dimension_semantics<parallel>, #tpu.dimension_semantics<parallel>], iteration_bounds = array<i64: 1, 2, 1, 1>, scalar_prefetch = 0 : i64, scratch_operands = 0 : i64, tpu.core_type = #tpu.core_type<tc>, window_params = [{transform_indices = @transform_0, window_bounds = array<i64: 1, 1, 8, 342>}, {transform_indices = @transform_1, window_bounds = array<i64: 1, 8, 72>}, {transform_indices = @transform_2, window_bounds = array<i64: 1, 8, 1>}, {transform_indices = @transform_3, window_bounds = array<i64: 1, 1, 8, 288>}]} {
    %c0 = arith.constant 0 : index
    %c0_0 = arith.constant 0 : index
    %c0_1 = arith.constant 0 : index
    %c0_2 = arith.constant 0 : index
    %0 = vector.load %arg4[%c0, %c0_0, %c0_1, %c0_2] : memref<1x1x8x342xbf16, #tpu.memory_space<vmem>>, vector<1x1x8x288xbf16>
    %1 = vector.shape_cast %0 : vector<1x1x8x288xbf16> to vector<8x288xbf16>
    %c0_3 = arith.constant 0 : index
    %c0_4 = arith.constant 0 : index
    %c0_5 = arith.constant 0 : index
    %c1 = arith.constant 1 : index
    %2 = vector.load %arg4[%c0_3, %c0_4, %c0_5, %c1] : memref<1x1x8x342xbf16, #tpu.memory_space<vmem>>, vector<1x1x8x288xbf16>
    %3 = vector.shape_cast %2 : vector<1x1x8x288xbf16> to vector<8x288xbf16>
    %c0_6 = arith.constant 0 : index
    %c0_7 = arith.constant 0 : index
    %c0_8 = arith.constant 0 : index
    %c2 = arith.constant 2 : index
    %4 = vector.load %arg4[%c0_6, %c0_7, %c0_8, %c2] : memref<1x1x8x342xbf16, #tpu.memory_space<vmem>>, vector<1x1x8x288xbf16>
    %5 = vector.shape_cast %4 : vector<1x1x8x288xbf16> to vector<8x288xbf16>
    %c0_9 = arith.constant 0 : index
    %c0_10 = arith.constant 0 : index
    %c0_11 = arith.constant 0 : index
    %c18 = arith.constant 18 : index
    %6 = vector.load %arg4[%c0_9, %c0_10, %c0_11, %c18] : memref<1x1x8x342xbf16, #tpu.memory_space<vmem>>, vector<1x1x8x288xbf16>
    %7 = vector.shape_cast %6 : vector<1x1x8x288xbf16> to vector<8x288xbf16>
    %c0_12 = arith.constant 0 : index
    %c0_13 = arith.constant 0 : index
    %c0_14 = arith.constant 0 : index
    %c19 = arith.constant 19 : index
    %8 = vector.load %arg4[%c0_12, %c0_13, %c0_14, %c19] : memref<1x1x8x342xbf16, #tpu.memory_space<vmem>>, vector<1x1x8x288xbf16>
    %9 = vector.shape_cast %8 : vector<1x1x8x288xbf16> to vector<8x288xbf16>
    %c0_15 = arith.constant 0 : index
    %c0_16 = arith.constant 0 : index
    %c0_17 = arith.constant 0 : index
    %c20 = arith.constant 20 : index
    %10 = vector.load %arg4[%c0_15, %c0_16, %c0_17, %c20] : memref<1x1x8x342xbf16, #tpu.memory_space<vmem>>, vector<1x1x8x288xbf16>
    %11 = vector.shape_cast %10 : vector<1x1x8x288xbf16> to vector<8x288xbf16>
    %c0_18 = arith.constant 0 : index
    %c0_19 = arith.constant 0 : index
    %c0_20 = arith.constant 0 : index
    %c36 = arith.constant 36 : index
    %12 = vector.load %arg4[%c0_18, %c0_19, %c0_20, %c36] : memref<1x1x8x342xbf16, #tpu.memory_space<vmem>>, vector<1x1x8x288xbf16>
    %13 = vector.shape_cast %12 : vector<1x1x8x288xbf16> to vector<8x288xbf16>
    %c0_21 = arith.constant 0 : index
    %c0_22 = arith.constant 0 : index
    %c0_23 = arith.constant 0 : index
    %c37 = arith.constant 37 : index
    %14 = vector.load %arg4[%c0_21, %c0_22, %c0_23, %c37] : memref<1x1x8x342xbf16, #tpu.memory_space<vmem>>, vector<1x1x8x288xbf16>
    %15 = vector.shape_cast %14 : vector<1x1x8x288xbf16> to vector<8x288xbf16>
    %c0_24 = arith.constant 0 : index
    %c0_25 = arith.constant 0 : index
    %c0_26 = arith.constant 0 : index
    %c38 = arith.constant 38 : index
    %16 = vector.load %arg4[%c0_24, %c0_25, %c0_26, %c38] : memref<1x1x8x342xbf16, #tpu.memory_space<vmem>>, vector<1x1x8x288xbf16>
    %17 = vector.shape_cast %16 : vector<1x1x8x288xbf16> to vector<8x288xbf16>
    %18 = tpu.concatenate %1, %3, %5, %7, %9, %11, %13, %15, %17 in 0 : vector<8x288xbf16>, vector<8x288xbf16>, vector<8x288xbf16>, vector<8x288xbf16>, vector<8x288xbf16>, vector<8x288xbf16>, vector<8x288xbf16>, vector<8x288xbf16>, vector<8x288xbf16> -> vector<72x288xbf16>
    %c0_27 = arith.constant 0 : index
    %c0_28 = arith.constant 0 : index
    %c0_29 = arith.constant 0 : index
    %19 = vector.load %arg5[%c0_27, %c0_28, %c0_29] : memref<1x8x72xbf16, #tpu.memory_space<vmem>>, vector<1x8x72xbf16>
    %20 = vector.shape_cast %19 : vector<1x8x72xbf16> to vector<8x72xbf16>
    %cst = arith.constant dense<0.000000e+00> : vector<8x288xf32>
    %21 = tpu.matmul %20, %18, %cst {dimension_numbers = #tpu.dot_dimension_numbers<[1], [0], [0], [1], [0, 0, 1, 1], [], []>} : vector<8x72xbf16>, vector<72x288xbf16>, vector<8x288xf32> -> vector<8x288xf32>
    %c0_30 = arith.constant 0 : index
    %c0_31 = arith.constant 0 : index
    %c0_32 = arith.constant 0 : index
    %22 = vector.load %arg6[%c0_30, %c0_31, %c0_32] : memref<1x8x1xf32, #tpu.memory_space<vmem>>, vector<1x8x1xf32>
    %23 = vector.shape_cast %22 : vector<1x8x1xf32> to vector<8x1xf32>
    %24 = vector.broadcast %23 : vector<8x1xf32> to vector<8x288xf32>
    %25 = arith.addf %21, %24 : vector<8x288xf32>
    %c0_33 = arith.constant 0 : index
    %c0_34 = arith.constant 0 : index
    %c0_35 = arith.constant 0 : index
    %c0_36 = arith.constant 0 : index
    %26 = vector.load %arg7[%c0_33, %c0_34, %c0_35, %c0_36] : memref<1x1x8x288xf32, #tpu.memory_space<vmem>>, vector<1x1x8x288xf32>
    %27 = vector.shape_cast %26 : vector<1x1x8x288xf32> to vector<8x288xf32>
    %28 = vector.shape_cast %25 : vector<8x288xf32> to vector<1x1x8x288xf32>
    tpu.vector_store %arg7[%c0_33, %c0_34, %c0_35, %c0_36], %28 {strides = array<i32>} : memref<1x1x8x288xf32, #tpu.memory_space<vmem>>, vector<1x1x8x288xf32>,
    return
  }
  func.func @transform_0(%arg0: i32, %arg1: i32, %arg2: i32, %arg3: i32) -> (i32, i32, i32, i32) {
    %c0_i32 = arith.constant 0 : i32
    %c0_i32_0 = arith.constant 0 : i32
    %c0_i32_1 = arith.constant 0 : i32
    return %arg1, %arg0, %c0_i32, %c0_i32_0 : i32, i32, i32, i32
  }
  func.func @transform_1(%arg0: i32, %arg1: i32, %arg2: i32, %arg3: i32) -> (i32, i32, i32) {
    %c0_i32 = arith.constant 0 : i32
    %c0_i32_0 = arith.constant 0 : i32
    return %arg0, %arg2, %c0_i32 : i32, i32, i32
  }
  func.func @transform_2(%arg0: i32, %arg1: i32, %arg2: i32, %arg3: i32) -> (i32, i32, i32) {
    %c0_i32 = arith.constant 0 : i32
    %c0_i32_0 = arith.constant 0 : i32
    return %arg0, %arg2, %c0_i32 : i32, i32, i32
  }
  func.func @transform_3(%arg0: i32, %arg1: i32, %arg2: i32, %arg3: i32) -> (i32, i32, i32, i32) {
    %c0_i32 = arith.constant 0 : i32
    return %arg1, %arg0, %arg2, %arg3 : i32, i32, i32, i32
  }
}

</mosaic_0001>

<bundles_post_ra>
// kernel: lora_conv2d.1
= control target key start
LH: loop header
LB: loop body
LE: loop exit
PB: predicated region body
PF: predicated region fallthrough
CT: control target
= control target key end

     0   :  { %s832_s12 = smov 0   ;;  %s834_s13 = smov 0   ;;  %s896_s0 = inlined_call_operand.vmem [shape: bf16[2,1,8,342], index: 0, kind: input, shape index: {}]   ;;  %s897_s1 = inlined_call_operand.vmem [shape: bf16[1,8,72], index: 1, kind: input, shape index: {}]   ;;  %s898_s2 = inlined_call_operand.vmem [shape: f32[1,8,1], index: 2, kind: input, shape index: {}]   ;;  %s899_s3 = inlined_call_operand.vmem [shape: f32[2,1,8,288], index: 3, kind: output, shape index: {}]  }
   0x1   :  { %s836_s14 = smov 0  }
   0x2 LB: > { %s35_s15 = sadd.s32 1, %s795_s13  ;;  %p705_p0 = scmp.ge.s32.totalorder %s799_s14, 1  ;;  %s799_s14 = sphi %s836_s14, %s13_s14   ;;  %s795_s13 = sphi %s834_s13, %s901_s13   ;;  %s791_s12 = sphi %s832_s12, %s900_s12  }
   0x3   : > { %p37_p1 = scmp.ge.s32.totalorder %s35_s15, 2  ;;  %p203_p2 = scmp.lt.s32.totalorder %s799_s14, 3 }
   0x5   : > { %s903_s15 = smov (%p37_p1, %s35_s15), 0  ;;  %p204_p3 = pnand %p705_p0, %p203_p2 }
   0x6   : > { %p257_p4 = scmp.lt.s32.totalorder (!%p204_p3), %s791_s12, 1  ;;  %v801_v0 = vmov (!%p204_p3), 0.0   ;;  %s802_s20 = smov (!%p204_p3), 127   ;;  %vm809_vm0 = vmmov (!%p204_p3), 0   ;;  %v810_v5 = vmov (!%p204_p3), 0   ;;  %v431_v6 = vld [vmem:[%s898_s2] sm:$0xff] (!%p204_p3) }
   0x7   : > { %207 = sbr.rel (%p204_p3) target bundleno = 401 (0x191), region = 32  ;;  %722 = vmatprep.subr.bf16.mxu1 (!%p204_p3), %v801_v0  ;;  %s803_s21 = smov (!%p204_p3), 126   ;;  %732 = vmatprep.mubr.msk.bf16.mxu1 (!%p204_p3), %vm809_vm0, %v801_v0  ;;  %vm315_vm1 = vcmask (!%p204_p3), 1039360   ;;  %vm381_vm2 = vcmask (!%p204_p3), 1043456   ;;  %vm324_vm3 = vcmask (!%p204_p3), 1031168   ;;  %vm333_vm4 = vcmask (!%p204_p3), 900096  }
   0x8   : > { %s804_s22 = smov (!%p204_p3), 110   ;;  %s805_s23 = smov (!%p204_p3), 109   ;;  %482 = vmatprep.mubr.bf16.mxu0 (!%p204_p3), %v810_v5  ;;  %773 = vset.pattern.permute.xlu0 (!%p204_p3), %v810_v5  ;;  %vm342_vm5 = vcmask (!%p204_p3), 891904   ;;  %vm351_vm6 = vcmask (!%p204_p3), 883712   ;;  %vm360_vm7 = vcmask (!%p204_p3), 752640   ;;  %vm369_vm8 = vcmask (!%p204_p3), 744448  }
   0x9   : > { %s806_s24 = smov (!%p204_p3), 108   ;;  %s807_s25 = smov (!%p204_p3), 92   ;;  %vm378_vm9 = vcmask (!%p204_p3), 736256   ;;  %v430_v61 = vld [vmem:[%s897_s1] sm:$0xf] (!%p204_p3)  ;;  %vm437_vm10 = vcmask (!%p204_p3), 588800  }
   0xa   : > { %s808_s26 = smov (!%p204_p3), 91   ;;  %s811_s27 = smov (!%p204_p3), 90   ;;  %vm533_vm11 = vcmask (!%p204_p3), 261120  }
   0xe   : > { %s905_s12 = smov (!%p257_p4, %s791_s12), 1 }
   0xf   : > { %s736_s16 = smul.u32 12, %s905_s12 }
  0x10   : > { %s737_s5 = smul.u32 24, %s905_s12 }
  0x11   : > { %s265_s19 = scalar_lea.vmem %s896_s0, %s736_s16 }
  0x12   : > { %v299_v1 = vld [vmem:[%s265_s19] sm:$0xff]  ;;  %v776_v4 = vld [vmem:[%s265_s19 + $0x8] ss:$0 sps:$4 sm:$0xff]   ;;  %s296_s8 = scalar_lea.vmem %s899_s3, %s737_s5 }
  0x13   : > { %v709_v2 = vcombine.high %v299_v1, %v299_v1  ;;  %v708_v3 = vcombine.low %v299_v1, %v299_v1 }
  0x15   : > { %311 = vrot.lane.b32.xlu0 %v709_v2, %s802_s20  ;;  %309 = vrot.lane.b32.xlu1 %v708_v3, %s802_s20 }
  0x19   : > { %313 = vrot.lane.b32.xlu0 %v776_v4, %s802_s20  ;;  %320 = vrot.lane.b32.xlu1 %v709_v2, %s803_s21 }
  0x1d   : > { %322 = vrot.lane.b32.xlu0 %v776_v4, %s803_s21  ;;  %329 = vrot.lane.b32.xlu1 %v709_v2, %s804_s22 }
  0x21   : > { %331 = vrot.lane.b32.xlu0 %v776_v4, %s804_s22  ;;  %318 = vrot.lane.b32.xlu1 %v708_v3, %s803_s21 }
  0x25   : > { %327 = vrot.lane.b32.xlu0 %v708_v3, %s804_s22  ;;  %338 = vrot.lane.b32.xlu1 %v709_v2, %s805_s23 }
  0x29   : > { %340 = vrot.lane.b32.xlu0 %v776_v4, %s805_s23  ;;  %347 = vrot.lane.b32.xlu1 %v709_v2, %s806_s24 }
  0x2d   : > { %349 = vrot.lane.b32.xlu0 %v776_v4, %s806_s24  ;;  %336 = vrot.lane.b32.xlu1 %v708_v3, %s805_s23 }
  0x31   : > { %345 = vrot.lane.b32.xlu0 %v708_v3, %s806_s24  ;;  %356 = vrot.lane.b32.xlu1 %v709_v2, %s807_s25 }
  0x35   : > { %358 = vrot.lane.b32.xlu0 %v776_v4, %s807_s25  ;;  %365 = vrot.lane.b32.xlu1 %v709_v2, %s808_s26 }
  0x39   : > { %367 = vrot.lane.b32.xlu0 %v776_v4, %s808_s26  ;;  %354 = vrot.lane.b32.xlu1 %v708_v3, %s807_s25 }
  0x3d   : > { %363 = vrot.lane.b32.xlu0 %v708_v3, %s808_s26  ;;  %372 = vrot.lane.b32.xlu1 %v708_v3, %s811_s27 }
  0x41   : > { %374 = vrot.lane.b32.xlu0 %v709_v2, %s811_s27  ;;  %376 = vrot.lane.b32.xlu1 %v776_v4, %s811_s27 }
  0x45   : > { %434 = vperm.xlu0 %773, %v431_v6  }
  0x87   : > { %v312_v7 = vpop.permute.xlu0 %311  ;;  %v310_v8 = vpop.permute.xlu1 %309 }
  0x88   : > { %v316_v9 = vsel %vm315_vm1, %v310_v8, %v312_v7 }
  0x89   : > { %v384_v15 = vsel %vm381_vm2, %v708_v3, %v316_v9 }
  0x8b   : > { %v314_v10 = vpop.permute.xlu0 %313  ;;  %v321_v11 = vpop.permute.xlu1 %320 }
  0x8c   : > { %v317_v12 = vsel %vm315_vm1, %v312_v7, %v314_v10  ;;  %v392_v13 = vsel %vm381_vm2, %v776_v4, %v314_v10 }
  0x8d   : > { %723 = vmatpush3.bf16.msra.mxu1 %v392_v13  ;;  %v388_v14 = vsel %vm381_vm2, %v709_v2, %v317_v12 }
  0x8e   : > { %450 = vmatprep.subr.bf16.mxu0 %v388_v14  ;;  %724 = vmatprep.subr.bf16.mxu1 %v801_v0 }
  0x8f   : > { %v323_v16 = vpop.permute.xlu0 %322  ;;  %451 = vmatpush1.bf16.msra.mxu0 %v384_v15  ;;  %v330_v17 = vpop.permute.xlu1 %329 }
  0x90   : > { %v326_v20 = vsel %vm324_vm3, %v321_v11, %v323_v16 }
  0x93   : > { %v332_v18 = vpop.permute.xlu0 %331  ;;  %v319_v19 = vpop.permute.xlu1 %318 }
  0x94   : > { %v335_v21 = vsel %vm333_vm4, %v330_v17, %v332_v18  ;;  %v404_v22 = vsel %vm381_vm2, %v323_v16, %v332_v18  ;;  %v325_v26 = vsel %vm324_vm3, %v319_v19, %v321_v11 }
  0x95   : > { %725 = vmatpush3.bf16.msra.mxu1 %v404_v22  ;;  %v400_v23 = vsel %vm381_vm2, %v326_v20, %v335_v21 }
  0x96   : > { %452 = vmatprep.subr.bf16.mxu0 %v400_v23  ;;  %726 = vmatprep.subr.bf16.mxu1 %v801_v0 }
  0x97   : > { %v328_v24 = vpop.permute.xlu0 %327  ;;  %v339_v25 = vpop.permute.xlu1 %338 }
  0x98   : > { %v334_v27 = vsel %vm333_vm4, %v328_v24, %v330_v17 }
  0x99   : > { %v396_v28 = vsel %vm381_vm2, %v325_v26, %v334_v27 }
  0x9a   : > { %453 = vmatpush1.bf16.msra.mxu0 %v396_v28 }
  0x9b   : > { %v341_v29 = vpop.permute.xlu0 %340  ;;  %v348_v30 = vpop.permute.xlu1 %347 }
  0x9c   : > { %v344_v33 = vsel %vm342_vm5, %v339_v25, %v341_v29 }
  0x9f   : > { %v350_v31 = vpop.permute.xlu0 %349  ;;  %v337_v32 = vpop.permute.xlu1 %336 }
  0xa0   : > { %v353_v34 = vsel %vm351_vm6, %v348_v30, %v350_v31  ;;  %v416_v35 = vsel %vm381_vm2, %v341_v29, %v350_v31  ;;  %v343_v39 = vsel %vm342_vm5, %v337_v32, %v339_v25 }
  0xa1   : > { %727 = vmatpush3.bf16.msra.mxu1 %v416_v35  ;;  %v412_v36 = vsel %vm381_vm2, %v344_v33, %v353_v34 }
  0xa2   : > { %454 = vmatprep.subr.bf16.mxu0 %v412_v36  ;;  %728 = vmatprep.subr.bf16.mxu1 %v801_v0 }
  0xa3   : > { %v346_v37 = vpop.permute.xlu0 %345  ;;  %v357_v38 = vpop.permute.xlu1 %356 }
  0xa4   : > { %v352_v40 = vsel %vm351_vm6, %v346_v37, %v348_v30 }
  0xa5   : > { %v408_v41 = vsel %vm381_vm2, %v343_v39, %v352_v40 }
  0xa6   : > { %455 = vmatpush1.bf16.msra.mxu0 %v408_v41 }
  0xa7   : > { %v359_v42 = vpop.permute.xlu0 %358  ;;  %v366_v43 = vpop.permute.xlu1 %365 }
  0xa8   : > { %v362_v46 = vsel %vm360_vm7, %v357_v38, %v359_v42 }
  0xab   : > { %v368_v44 = vpop.permute.xlu0 %367  ;;  %v355_v45 = vpop.permute.xlu1 %354 }
  0xac   : > { %v371_v47 = vsel %vm369_vm8, %v366_v43, %v368_v44  ;;  %v428_v48 = vsel %vm381_vm2, %v359_v42, %v368_v44  ;;  %v361_v52 = vsel %vm360_vm7, %v355_v45, %v357_v38 }
  0xad   : > { %729 = vmatpush3.bf16.msra.mxu1 %v428_v48  ;;  %v424_v49 = vsel %vm381_vm2, %v362_v46, %v371_v47 }
  0xae   : > { %456 = vmatprep.subr.bf16.mxu0 %v424_v49  ;;  %730 = vmatprep.subr.bf16.mxu1 %v801_v0 }
  0xaf   : > { %v364_v50 = vpop.permute.xlu0 %363  ;;  %v373_v51 = vpop.permute.xlu1 %372 }
  0xb0   : > { %v370_v53 = vsel %vm369_vm8, %v364_v50, %v366_v43 }
  0xb1   : > { %v420_v54 = vsel %vm381_vm2, %v361_v52, %v370_v53 }
  0xb2   : > { %457 = vmatpush1.bf16.msra.mxu0 %v420_v54 }
  0xb3   : > { %v375_v55 = vpop.permute.xlu0 %374  ;;  %v377_v56 = vpop.permute.xlu1 %376 }
  0xb4   : > { %v379_v57 = vsel %vm378_vm9, %v373_v51, %v375_v55  ;;  %v380_v58 = vsel %vm378_vm9, %v375_v55, %v377_v56  ;;  %v448_v59 = vsel %vm381_vm2, %v377_v56, 0 }
  0xb5   : > { %711 = vmatprep.subr.msk.bf16.mxu0 %vm381_vm2, %v380_v58  ;;  %731 = vmatpush3.bf16.msra.mxu1 %v448_v59  ;;  %v442_v60 = vsel %vm381_vm2, %v379_v57, 0 }
  0xb6   : > { %459 = vmatpush1.bf16.msra.mxu0 %v442_v60 }
  0xb8   : > { %733 = vmatmul.mubr.msk.bf16.vlgmr.msra.gmra.mrb[0].mxu1 %vm437_vm10, %v430_v61 }
  0xb9   : > { %712 = vmatmul.mubr.msk.bf16.vlgmr.msra.gmra.mrb[0].mxu0 %vm437_vm10, %v430_v61 }
  0xc4   : > { %v435_v62 = vpop.permute.xlu0 %434 }
 0x18b   : > { %v525_v63 = vpop.f32.mrb[0].mxu1 }
 0x18c   : > { %v526_v0 = vadd.f32 %v525_v63, %v435_v62  ;;  %v484_v1 = vpop.f32.mrb[0].mxu0  ;;  %v734_v2 = vpop.f32.mrb[1].mxu1 }
 0x18d   : > { %v485_v3 = vadd.f32 %v484_v1, %v435_v62  ;;  %v486_v4 = vpop.f32.mrb[1].mxu0  ;;  %v528_v5 = vpop.f32.mrb[2].mxu1 }
 0x18e   : > { %534 = vst.msk [vmem:[%s296_s8 + $0x10] sm:$0xff] %vm533_vm11, %v526_v0  ;;  %v487_v6 = vadd.f32 %v486_v4, %v435_v62  ;;  %v488_v7 = vpop.f32.mrb[2].mxu0  ;;  %v735_v8 = vpop.f32.mrb[3].mxu1 }
 0x18f   : > { %531 = vst [vmem:[%s296_s8] sm:$0xff] %v485_v3  ;;  %v489_v9 = vpop.f32.mrb[3].mxu0 }
 0x190   : > { %532 = vst [vmem:[%s296_s8 + $0x8] sm:$0xff] %v487_v6 }
 0x191 PF: > { %s13_s14 = sadd.s32 1, %s799_s14   ;;  %s900_s12 = smov %s795_s13 }
 0x192   : > { %p10_p5 = scmp.ge.s32.totalorder %s13_s14, 4   ;;  %s901_s13 = smov %s903_s15 }
 0x194   :  { %12 = sbr.rel (!%p10_p5) target bundleno = 2 (0x2), region = 68 }

</bundles_post_ra>
